<compile_context>
chip_gen: v5e
topology: v5e:2x2
jax: 0.10.0
libtpu: 0.0.40
codegen_flags: <defaults>
</compile_context>

<pallas_src>
import functools
import math

import jax
import jax.numpy as jnp
from jax.experimental import pallas as pl
from jax.experimental.pallas import tpu as pltpu


# ---------------------------------------------------------------------------
# Kernel
# ---------------------------------------------------------------------------

def _gelu_kernel(x_ref, o_ref):
    x = x_ref[...].astype(jnp.float32)
    c = jnp.float32(0.7978845608028654)                 # sqrt(2/pi)
    inner = c * (x + jnp.float32(0.044715) * x * x * x)
    y = jnp.float32(0.5) * x * (jnp.float32(1.0) + jnp.tanh(inner))
    o_ref[...] = y.astype(o_ref.dtype)


def _gelu_jnp(x):
    xf = x.astype(jnp.float32)
    c = jnp.float32(0.7978845608028654)
    y = 0.5 * xf * (1.0 + jnp.tanh(c * (xf + 0.044715 * xf * xf * xf)))
    return y.astype(x.dtype)


# ---------------------------------------------------------------------------
# Wrapper helpers
# ---------------------------------------------------------------------------

def _round_up(a, b):
    return (a + b - 1) // b * b


def _cdiv(a, b):
    return -(-a // b)


def _sublane(dtype):
    # Min second-to-last tile dim: 8 for 4-byte, 16 for 2-byte, 32 for 1-byte.
    return max(8, 32 // jnp.dtype(dtype).itemsize)


@functools.lru_cache(maxsize=None)
def _budgets():
    """(block_byte_budget, vmem_limit_bytes) per TPU generation."""
    vmem_cap = None
    try:
        vmem_cap = pltpu.get_tpu_info().vmem_capacity_bytes
    except Exception:
        pass
    if vmem_cap is not None and vmem_cap >= 96 * 1024 * 1024:
        # v5e / v6e: 128 MiB physical VMEM -> big blocks, generous scoped limit.
        return 8 * 1024 * 1024, 64 * 1024 * 1024
    # v7x (64 MiB per TensorCore) or unknown: conservative.
    return 4 * 1024 * 1024, 40 * 1024 * 1024


# ---------------------------------------------------------------------------
# Wrapper
# ---------------------------------------------------------------------------

def gelu(x, *, min_pallas_bytes=1 << 20, force_pallas=False):
    """Tanh-GELU applied elementwise; works for any input rank/dtype."""
    orig_shape = x.shape
    total = math.prod(orig_shape) if orig_shape else 1
    itemsize = jnp.dtype(x.dtype).itemsize
    if total == 0:
        return x
    if (not force_pallas) and total * itemsize < min_pallas_bytes:
        # Pallas fixed cost + pad/slice would dominate for tiny inputs.
        return _gelu_jnp(x)

    sub = _sublane(x.dtype)
    block_budget, vmem_limit = _budgets()

    # Lane width W: prefer one that needs zero padding (total % (W*sub) == 0),
    # always a large multiple of 128 -> unmasked, lane-dense stores.
    W = None
    for cand in (8192, 4096, 2048, 1024, 512, 256, 128):
        if total % (cand * sub) == 0:
            W = cand
            break
    if W is None:
        W = 2048

    rows_min = _round_up(_cdiv(total, W), sub)

    # Row-tile from the byte budget; split rows as evenly as possible so pad
    # waste is at most (sub-1) rows per block.
    budget_rows = max(sub, (block_budget // (W * itemsize)) // sub * sub)
    n_blocks = _cdiv(rows_min, budget_rows)
    if n_blocks == 1 and rows_min % (2 * sub) == 0:
        n_blocks = 2                      # give megacore (v7x) both TCs for free
    tm = _round_up(_cdiv(rows_min, n_blocks), sub)
    rows_pad = tm * n_blocks
    total_pad = rows_pad * W

    xf = x.reshape(-1)
    if total_pad != total:
        xf = jnp.pad(xf, (0, total_pad - total))   # GELU(0) == 0, sliced off below
    x2 = xf.reshape(rows_pad, W)

    out = pl.pallas_call(
        _gelu_kernel,
        out_shape=jax.ShapeDtypeStruct((rows_pad, W), x.dtype),
        grid=(n_blocks,),
        in_specs=[pl.BlockSpec((tm, W), lambda i: (i, 0))],
        out_specs=pl.BlockSpec((tm, W), lambda i: (i, 0)),
        compiler_params=pltpu.CompilerParams(
            dimension_semantics=("parallel",),
            vmem_limit_bytes=vmem_limit,
        ),
    )(x2)

    outf = out.reshape(-1)
    if total_pad != total:
        outf = outf[:total]
    return outf.reshape(orig_shape)


# ---------------------------------------------------------------------------
# Main
# ---------------------------------------------------------------------------

if __name__ == "__main__":
    key = jax.random.PRNGKey(0)

    def ref_gelu(x):
        return 0.5 * x * (1.0 + jnp.tanh(jnp.sqrt(2.0 / jnp.pi)
                                         * (x + 0.044715 * x ** 3)))

    # Spec shape: x = torch.rand(2, 3, 768).  Tiny, so force the Pallas path to
    # actually exercise the kernel (default wrapper would short-circuit to jnp).
    x_small = jax.random.uniform(key, (2, 3, 768), dtype=jnp.float32)
    y_small = jax.block_until_ready(
        jax.jit(functools.partial(gelu, force_pallas=True))(x_small))
    assert y_small.shape == x_small.shape
    assert bool(jnp.all(jnp.isfinite(y_small)))
    assert bool(jnp.allclose(y_small, ref_gelu(x_small), atol=1e-5, rtol=1e-5)), \
        float(jnp.max(jnp.abs(y_small - ref_gelu(x_small))))

    # Slightly larger input (>= 1 MiB) exercises the default multi-block path
    # with zero padding (total divides W * sublane).
    x_big = jax.random.uniform(jax.random.PRNGKey(0), (4, 128, 768),
                               dtype=jnp.float32)
    y_big = jax.block_until_ready(jax.jit(gelu)(x_big))
    assert y_big.shape == x_big.shape
    assert bool(jnp.allclose(y_big, ref_gelu(x_big), atol=1e-5, rtol=1e-5)), \
        float(jnp.max(jnp.abs(y_big - ref_gelu(x_big))))

    print("KERNEL_OK")
</pallas_src>

<mosaic_0001>
module attributes {stable_mosaic.version = 11 : i64} {
  func.func @_gelu_kernel(%arg0: i32, %arg1: memref<8x2048xf32, #tpu.memory_space<vmem>>, %arg2: memref<8x2048xf32, #tpu.memory_space<vmem>>) attributes {dimension_semantics = [#tpu.dimension_semantics<parallel>], iteration_bounds = array<i64: 1>, scalar_prefetch = 0 : i64, scratch_operands = 0 : i64, tpu.core_type = #tpu.core_type<tc>, window_params = [{transform_indices = @transform_0, window_bounds = array<i64: 8, 2048>}, {transform_indices = @transform_1, window_bounds = array<i64: 8, 2048>}]} {
    %c0 = arith.constant 0 : index
    %c0_0 = arith.constant 0 : index
    %0 = vector.load %arg1[%c0, %c0_0] : memref<8x2048xf32, #tpu.memory_space<vmem>>, vector<8x2048xf32>
    %cst = arith.constant 4.471500e-02 : f32
    %1 = vector.broadcast %cst : f32 to vector<8x2048xf32>
    %2 = arith.mulf %1, %0 : vector<8x2048xf32>
    %3 = arith.mulf %2, %0 : vector<8x2048xf32>
    %4 = arith.mulf %3, %0 : vector<8x2048xf32>
    %5 = arith.addf %0, %4 : vector<8x2048xf32>
    %cst_1 = arith.constant 0.797884583 : f32
    %6 = vector.broadcast %cst_1 : f32 to vector<8x2048xf32>
    %7 = arith.mulf %6, %5 : vector<8x2048xf32>
    %cst_2 = arith.constant 5.000000e-01 : f32
    %8 = vector.broadcast %cst_2 : f32 to vector<8x2048xf32>
    %9 = arith.mulf %8, %0 : vector<8x2048xf32>
    %10 = math.tanh %7 : vector<8x2048xf32>
    %cst_3 = arith.constant 1.000000e+00 : f32
    %11 = vector.broadcast %cst_3 : f32 to vector<8x2048xf32>
    %12 = arith.addf %11, %10 : vector<8x2048xf32>
    %13 = arith.mulf %9, %12 : vector<8x2048xf32>
    %c0_4 = arith.constant 0 : index
    %c0_5 = arith.constant 0 : index
    %14 = vector.load %arg2[%c0_4, %c0_5] : memref<8x2048xf32, #tpu.memory_space<vmem>>, vector<8x2048xf32>
    tpu.vector_store %arg2[%c0_4, %c0_5], %13 {strides = array<i32>} : memref<8x2048xf32, #tpu.memory_space<vmem>>, vector<8x2048xf32>,
    return
  }
  func.func @transform_0(%arg0: i32) -> (i32, i32) {
    %c0_i32 = arith.constant 0 : i32
    %c0_i32_0 = arith.constant 0 : i32
    return %arg0, %c0_i32 : i32, i32
  }
  func.func @transform_1(%arg0: i32) -> (i32, i32) {
    %c0_i32 = arith.constant 0 : i32
    %c0_i32_0 = arith.constant 0 : i32
    return %arg0, %c0_i32 : i32, i32
  }
}

</mosaic_0001>

<bundles_post_ra>
// kernel: gelu.1
= control target key start
LH: loop header
LB: loop body
LE: loop exit
PB: predicated region body
PF: predicated region fallthrough
CT: control target
= control target key end

     0   :  { %s377_s0 = inlined_call_operand.vmem [shape: f32[8,2048], index: 0, kind: input, shape index: {}]   ;;  %s378_s1 = inlined_call_operand.vmem [shape: f32[8,2048], index: 1, kind: output, shape index: {}]  }
   0x1   :  { %v8_v0 = vld [vmem:[%s377_s0] sm:$0xff]  ;;  %v9_v1 = vld [vmem:[%s377_s0 + $0x8] sm:$0xff]  ;;  %v10_v2 = vld [vmem:[%s377_s0 + $0x10] sm:$0xff] }
   0x2   :  { %v24_v3 = vmul.f32 0.044715, %v8_v0  ;;  %v25_v4 = vmul.f32 0.044715, %v9_v1  ;;  %v26_v5 = vmul.f32 0.044715, %v10_v2 }
   0x3   :  { %v11_v6 = vld [vmem:[%s377_s0 + $0x18] sm:$0xff]  ;;  %v12_v7 = vld [vmem:[%s377_s0 + $0x20] sm:$0xff]  ;;  %v13_v8 = vld [vmem:[%s377_s0 + $0x28] sm:$0xff]  ;;  %v251_v13 = vmul.f32 0.5, %v8_v0  ;;  %v253_v19 = vmul.f32 0.5, %v9_v1  ;;  %v258_v28 = vmul.f32 0.5, %v10_v2 }
   0x4   :  { %v40_v9 = vmul.f32 %v24_v3, %v8_v0  ;;  %v41_v10 = vmul.f32 %v25_v4, %v9_v1  ;;  %v27_v11 = vmul.f32 0.044715, %v11_v6  ;;  %v14_v12 = vld [vmem:[%s377_s0 + $0x30] sm:$0xff]  ;;  %v42_v14 = vmul.f32 %v26_v5, %v10_v2  ;;  %v15_v25 = vld [vmem:[%s377_s0 + $0x38] sm:$0xff]  ;;  %v263_v42 = vld [vmem:[%s377_s0 + $0x40] sm:$0xff] }
   0x5   :  { %v28_v15 = vmul.f32 0.044715, %v12_v7  ;;  %v29_v16 = vmul.f32 0.044715, %v13_v8  ;;  %v30_v24 = vmul.f32 0.044715, %v14_v12 }
   0x6   :  { %v56_v17 = vmul.f32 %v40_v9, %v8_v0  ;;  %v57_v18 = vmul.f32 %v41_v10, %v9_v1  ;;  %v43_v20 = vmul.f32 %v27_v11, %v11_v6  ;;  %v58_v21 = vmul.f32 %v42_v14, %v10_v2  ;;  %v268_v46 = vld [vmem:[%s377_s0 + $0x48] sm:$0xff]  ;;  %v273_v50 = vld [vmem:[%s377_s0 + $0x50] sm:$0xff]  ;;  %v279_v54 = vld [vmem:[%s377_s0 + $0x58] sm:$0xff] }
   0x7   :  { %v44_v22 = vmul.f32 %v28_v15, %v12_v7  ;;  %v45_v23 = vmul.f32 %v29_v16, %v13_v8  ;;  %v46_v33 = vmul.f32 %v30_v24, %v14_v12  ;;  %v31_v37 = vmul.f32 0.044715, %v15_v25 }
   0x8   :  { %v72_v26 = vadd.f32 %v56_v17, %v8_v0  ;;  %v73_v27 = vadd.f32 %v57_v18, %v9_v1  ;;  %v59_v29 = vmul.f32 %v43_v20, %v11_v6  ;;  %v74_v30 = vadd.f32 %v58_v21, %v10_v2 }
   0x9   :  { %v60_v31 = vmul.f32 %v44_v22, %v12_v7  ;;  %v61_v32 = vmul.f32 %v45_v23, %v13_v8  ;;  %v62_v41 = vmul.f32 %v46_v33, %v14_v12  ;;  %v107_v44 = vmul.f32 0.5, %v11_v6 }
   0xa   :  { %v88_v34 = vmul.f32 0.7978846, %v72_v26  ;;  %v89_v35 = vmul.f32 0.7978846, %v73_v27  ;;  %v75_v36 = vadd.f32 %v59_v29, %v11_v6  ;;  %v90_v38 = vmul.f32 0.7978846, %v74_v30 }
   0xb   :  { %v76_v39 = vadd.f32 %v60_v31, %v12_v7  ;;  %v77_v40 = vadd.f32 %v61_v32, %v13_v8  ;;  %v47_v45 = vmul.f32 %v31_v37, %v15_v25  ;;  %v78_v49 = vadd.f32 %v62_v41, %v14_v12  ;;  %v305_v30 = vld [vmem:[%s377_s0 + $0x60] sm:$0xff]  ;;  %v22_v37 = vld [vmem:[%s377_s0 + $0x70] sm:$0xff]  ;;  %v23_v41 = vld [vmem:[%s377_s0 + $0x78] sm:$0xff] }
   0xc   :  { %188 = vtanh.f32 %v88_v34  ;;  %v91_v43 = vmul.f32 0.7978846, %v75_v36  ;;  %v108_v51 = vmul.f32 0.5, %v12_v7  ;;  %v32_v53 = vmul.f32 0.044715, %v263_v42 }
   0xd   :  { %190 = vtanh.f32 %v89_v35  ;;  %v92_v47 = vmul.f32 0.7978846, %v76_v39  ;;  %v93_v48 = vmul.f32 0.7978846, %v77_v40  ;;  %v63_v52 = vmul.f32 %v47_v45, %v15_v25 }
   0xe   :  { %192 = vtanh.f32 %v90_v38  ;;  %v109_v55 = vmul.f32 0.5, %v13_v8  ;;  %v94_v56 = vmul.f32 0.7978846, %v78_v49  ;;  %v33_v57 = vmul.f32 0.044715, %v268_v46 }
   0xf   :  { %194 = vtanh.f32 %v91_v43  ;;  %v79_v58 = vadd.f32 %v63_v52, %v15_v25  ;;  %v48_v59 = vmul.f32 %v32_v53, %v263_v42  ;;  %v34_v60 = vmul.f32 0.044715, %v273_v50 }
  0x10   :  { %196 = vtanh.f32 %v92_v47  ;;  %v110_v61 = vmul.f32 0.5, %v14_v12  ;;  %v49_v62 = vmul.f32 %v33_v57, %v268_v46  ;;  %v35_v63 = vmul.f32 0.044715, %v279_v54 }
  0x11   :  { %198 = vtanh.f32 %v93_v48  ;;  %v95_v1 = vmul.f32 0.7978846, %v79_v58  ;;  %v64_v2 = vmul.f32 %v48_v59, %v263_v42  ;;  %v50_v3 = vmul.f32 %v34_v60, %v273_v50 }
  0x12   :  { %v189_v0 = vpop.eup %188  ;;  %200 = vtanh.f32 %v94_v56  ;;  %v111_v6 = vmul.f32 0.5, %v15_v25  ;;  %v65_v7 = vmul.f32 %v49_v62, %v268_v46  ;;  %v51_v8 = vmul.f32 %v35_v63, %v279_v54 }
  0x13   :  { %v191_v4 = vpop.eup %190  ;;  %v136_v5 = vadd.f32 1.0, %v189_v0  ;;  %202 = vtanh.f32 %v95_v1  ;;  %v80_v11 = vadd.f32 %v64_v2, %v263_v42  ;;  %v66_v12 = vmul.f32 %v50_v3, %v273_v50 }
  0x14   :  { %v193_v9 = vpop.eup %192  ;;  %v137_v10 = vadd.f32 1.0, %v191_v4  ;;  %v81_v17 = vadd.f32 %v65_v7, %v268_v46  ;;  %v67_v18 = vmul.f32 %v51_v8, %v279_v54  ;;  %v36_v40 = vmul.f32 0.044715, %v305_v30 }
  0x15   :  { %v195_v14 = vpop.eup %194  ;;  %v152_v15 = vmul.f32 %v136_v5, %v251_v13  ;;  %v138_v16 = vadd.f32 1.0, %v193_v9  ;;  %v96_v23 = vmul.f32 0.7978846, %v80_v11  ;;  %v82_v24 = vadd.f32 %v66_v12, %v273_v50 }
  0x16   :  { %v197_v20 = vpop.eup %196  ;;  %v153_v21 = vmul.f32 %v137_v10, %v253_v19  ;;  %v139_v22 = vadd.f32 1.0, %v195_v14  ;;  %v97_v27 = vmul.f32 0.7978846, %v81_v17  ;;  %v83_v29 = vadd.f32 %v67_v18, %v279_v54 }
  0x17   :  { %v199_v25 = vpop.eup %198  ;;  %168 = vst [vmem:[%s378_s1] sm:$0xff] %v152_v15  ;;  %v154_v26 = vmul.f32 %v138_v16, %v258_v28  ;;  %v140_v13 = vadd.f32 1.0, %v197_v20  ;;  %204 = vtanh.f32 %v96_v23  ;;  %v98_v33 = vmul.f32 0.7978846, %v82_v24  ;;  %v313_v28 = vld [vmem:[%s377_s0 + $0x68] sm:$0xff] }
  0x18   :  { %v201_v19 = vpop.eup %200  ;;  %169 = vst [vmem:[%s378_s1 + $0x8] sm:$0xff] %v153_v21  ;;  %v155_v31 = vmul.f32 %v139_v22, %v107_v44  ;;  %v141_v32 = vadd.f32 1.0, %v199_v25  ;;  %206 = vtanh.f32 %v97_v27  ;;  %v99_v36 = vmul.f32 0.7978846, %v83_v29 }
  0x19   :  { %170 = vst [vmem:[%s378_s1 + $0x10] sm:$0xff] %v154_v26  ;;  %v156_v34 = vmul.f32 %v140_v13, %v108_v51  ;;  %v142_v35 = vadd.f32 1.0, %v201_v19  ;;  %v203_v38 = vpop.eup %202  ;;  %208 = vtanh.f32 %v98_v33  ;;  %v37_v45 = vmul.f32 0.044715, %v313_v28 }
  0x1a   :  { %171 = vst [vmem:[%s378_s1 + $0x18] sm:$0xff] %v155_v31  ;;  %v157_v39 = vmul.f32 %v141_v32, %v109_v55  ;;  %v143_v44 = vadd.f32 1.0, %v203_v38  ;;  %210 = vtanh.f32 %v99_v36  ;;  %v52_v47 = vmul.f32 %v36_v40, %v305_v30 }
  0x1b   :  { %172 = vst [vmem:[%s378_s1 + $0x20] sm:$0xff] %v156_v34  ;;  %v158_v43 = vmul.f32 %v142_v35, %v110_v61  ;;  %v38_v48 = vmul.f32 0.044715, %v22_v37  ;;  %v112_v51 = vmul.f32 0.5, %v263_v42  ;;  %v53_v52 = vmul.f32 %v37_v45, %v313_v28 }
  0x1c   :  { %173 = vst [vmem:[%s378_s1 + $0x28] sm:$0xff] %v157_v39  ;;  %v159_v49 = vmul.f32 %v143_v44, %v111_v6  ;;  %v39_v53 = vmul.f32 0.044715, %v23_v41  ;;  %v113_v56 = vmul.f32 0.5, %v268_v46  ;;  %v68_v57 = vmul.f32 %v52_v47, %v305_v30 }
  0x1d   :  { %174 = vst [vmem:[%s378_s1 + $0x30] sm:$0xff] %v158_v43  ;;  %v205_v55 = vpop.eup %204  ;;  %v54_v58 = vmul.f32 %v38_v48, %v22_v37  ;;  %v114_v61 = vmul.f32 0.5, %v273_v50  ;;  %v69_v62 = vmul.f32 %v53_v52, %v313_v28  ;;  %v115_v1 = vmul.f32 0.5, %v279_v54 }
  0x1e   :  { %v207_v59 = vpop.eup %206  ;;  %175 = vst [vmem:[%s378_s1 + $0x38] sm:$0xff] %v159_v49  ;;  %v144_v60 = vadd.f32 1.0, %v205_v55  ;;  %v55_v42 = vmul.f32 %v39_v53, %v23_v41  ;;  %v84_v46 = vadd.f32 %v68_v57, %v305_v30  ;;  %v116_v17 = vmul.f32 0.5, %v305_v30 }
  0x1f   :  { %v209_v63 = vpop.eup %208  ;;  %v145_v0 = vadd.f32 1.0, %v207_v59  ;;  %v70_v2 = vmul.f32 %v54_v58, %v22_v37  ;;  %v85_v6 = vadd.f32 %v69_v62, %v313_v28  ;;  %v117_v20 = vmul.f32 0.5, %v313_v28 }
  0x20   :  { %v211_v3 = vpop.eup %210  ;;  %v160_v4 = vmul.f32 %v144_v60, %v112_v51  ;;  %v146_v5 = vadd.f32 1.0, %v209_v63  ;;  %v71_v7 = vmul.f32 %v55_v42, %v23_v41  ;;  %v100_v10 = vmul.f32 0.7978846, %v84_v46 }
  0x21   :  { %v161_v8 = vmul.f32 %v145_v0, %v113_v56  ;;  %v147_v9 = vadd.f32 1.0, %v211_v3  ;;  %v86_v50 = vadd.f32 %v70_v2, %v22_v37  ;;  %v101_v12 = vmul.f32 0.7978846, %v85_v6 }
  0x22   :  { %176 = vst [vmem:[%s378_s1 + $0x40] sm:$0xff] %v160_v4  ;;  %v162_v11 = vmul.f32 %v146_v5, %v114_v61  ;;  %v87_v54 = vadd.f32 %v71_v7, %v23_v41  ;;  %212 = vtanh.f32 %v100_v10  ;;  %v118_v23 = vmul.f32 0.5, %v22_v37 }
  0x23   :  { %177 = vst [vmem:[%s378_s1 + $0x48] sm:$0xff] %v161_v8  ;;  %v163_v14 = vmul.f32 %v147_v9, %v115_v1  ;;  %v102_v15 = vmul.f32 0.7978846, %v86_v50  ;;  %214 = vtanh.f32 %v101_v12  ;;  %v119_v26 = vmul.f32 0.5, %v23_v41 }
  0x24   :  { %178 = vst [vmem:[%s378_s1 + $0x50] sm:$0xff] %v162_v11  ;;  %v103_v16 = vmul.f32 0.7978846, %v87_v54 }
  0x25   :  { %179 = vst [vmem:[%s378_s1 + $0x58] sm:$0xff] %v163_v14  ;;  %216 = vtanh.f32 %v102_v15 }
  0x26   :  { %218 = vtanh.f32 %v103_v16 }
  0x28   :  { %v213_v18 = vpop.eup %212 }
  0x29   :  { %v215_v21 = vpop.eup %214  ;;  %v148_v22 = vadd.f32 1.0, %v213_v18 }
  0x2a   :  { %v149_v25 = vadd.f32 1.0, %v215_v21 }
  0x2b   :  { %v217_v24 = vpop.eup %216  ;;  %v164_v27 = vmul.f32 %v148_v22, %v116_v17 }
  0x2c   :  { %v219_v13 = vpop.eup %218  ;;  %v150_v29 = vadd.f32 1.0, %v217_v24  ;;  %v165_v19 = vmul.f32 %v149_v25, %v117_v20 }
  0x2d   :  { %v151_v31 = vadd.f32 1.0, %v219_v13  ;;  %180 = vst [vmem:[%s378_s1 + $0x60] sm:$0xff] %v164_v27 }
  0x2e   :  { %v166_v32 = vmul.f32 %v150_v29, %v118_v23  ;;  %181 = vst [vmem:[%s378_s1 + $0x68] sm:$0xff] %v165_v19 }
  0x2f   :  { %v167_v30 = vmul.f32 %v151_v31, %v119_v26 }
  0x30   :  { %182 = vst [vmem:[%s378_s1 + $0x70] sm:$0xff] %v166_v32 }
  0x31   :  { %183 = vst [vmem:[%s378_s1 + $0x78] sm:$0xff] %v167_v30 }

</bundles_post_ra>
